<compile_context>
chip_gen: v7x
topology: tpu7x:2x2x1
jax: 0.10.0
libtpu: 0.0.40
codegen_flags: <defaults>
</compile_context>

<pallas_src>
import functools

import jax
import jax.numpy as jnp
from jax.experimental import pallas as pl
from jax.experimental.pallas import tpu as pltpu

_LANE = 128      # lane width (last dim)
_SUBLANE = 8     # f32 sublane count (second-to-last dim)

# murmur3-finalizer multipliers, expressed as int32 two's complement.
_M1 = -1640531527   # 0x9E3779B9
_M2 = -2048144789   # 0x85EBCA6B
_M3 = -1028477387   # 0xC2B2AE35


def _round_up(x, m):
    return (x + m - 1) // m * m


def _vmem_budget_bytes():
    """~7/8 of the physical VMEM of the local TPU generation (conservative fallback)."""
    try:
        cap = int(pltpu.get_tpu_info().vmem_capacity_bytes)   # 128 MiB v5e/v6e, 64 MiB v7x
    except Exception:
        cap = 64 << 20                                        # safe for any generation
    return (cap // 8) * 7


def _auto_tile_b(B, F_pad, H_pad, O_pad, budget, x_itemsize):
    """Largest sublane-aligned batch tile that fits the per-generation VMEM budget."""
    # Double-buffered weights/biases (default pipeline) + per-row pipelined x/out tiles
    # + ~2 live f32 intermediates of width H_pad.
    weight_bytes = 2 * ((F_pad * H_pad + H_pad * H_pad + H_pad * O_pad) * 2
                        + (2 * H_pad + O_pad) * 4)
    per_row = 2 * F_pad * x_itemsize + 2 * O_pad * 2 + 2 * H_pad * 4
    avail = budget - weight_bytes - (4 << 20)        # headroom for Mosaic internal scratch
    tile = avail // per_row if avail > per_row else _SUBLANE
    tile = int(min(tile, 2048, _round_up(B, _SUBLANE)))
    return max(_SUBLANE, (tile // _SUBLANE) * _SUBLANE)


def _tile_random_bits(shape, seed, row0):
    """Stateless counter-based random bits for one batch tile (int32, full 32-bit mix).

    Uses only int32 add/mul/xor/shift/compare -> lowers on Mosaic VPU and in interpret
    mode.  Depends on the *global* element index, so the mask is independent of tiling.
    """
    r = jax.lax.broadcasted_iota(jnp.int32, shape, 0) + row0
    c = jax.lax.broadcasted_iota(jnp.int32, shape, 1)
    h = r * jnp.int32(shape[1]) + c
    h = h ^ (seed * jnp.int32(_M1))
    h = (h ^ (h >> 16)) * jnp.int32(_M2)
    h = (h ^ (h >> 13)) * jnp.int32(_M3)
    h = h ^ (h >> 16)
    return h


def _adv_net_kernel(seed_ref, x_ref, w1_ref, b1_ref, w2_ref, b2_ref,
                    w3_ref, b3_ref, o_ref, *, use_dropout: bool):
    """One batch tile: matmul -> +bias -> relu -> [dropout] -> ... -> logits (bf16)."""
    x = x_ref[...].astype(jnp.bfloat16)               # f32 -> bf16 in-kernel (MXU operand)

    # ad_layer1 + relu1
    h = jnp.dot(x, w1_ref[...], preferred_element_type=jnp.float32) + b1_ref[...]
    h = jnp.maximum(h, 0.0)

    if use_dropout:
        # One draw per tile; bit 31 -> layer-1 mask, bit 30 -> layer-2 mask (p = 0.5,
        # inverted dropout with the x2 scale fused into the mask values).
        # TODO(synk): RNG stream is not bit-identical to torch nn.Dropout (hash-based).
        bits = _tile_random_bits(h.shape, seed_ref[0],
                                 pl.program_id(0) * jnp.int32(h.shape[0]))
        mask1 = jnp.where(bits >= 0, 2.0, 0.0)
        mask2 = jnp.where((bits & jnp.int32(1 << 30)) == 0, 2.0, 0.0)
        h = h * mask1

    # ad_layer2 + relu2
    h = jnp.dot(h.astype(jnp.bfloat16), w2_ref[...],
                preferred_element_type=jnp.float32) + b2_ref[...]
    h = jnp.maximum(h, 0.0)
    if use_dropout:
        h = h * mask2

    # ad_layer3 (logits, lane-padded to 128; real logits are columns [:2])
    y = jnp.dot(h.astype(jnp.bfloat16), w3_ref[...],
                preferred_element_type=jnp.float32) + b3_ref[...]
    o_ref[...] = y.astype(o_ref.dtype)                # bf16 lane-dense writeback


def prepare_adversarial_network_params(params):
    """One-time prep: pad weights/biases to lane-aligned shapes, cast MXU operands to bf16.

    Call once (at init / after each optimizer step) and reuse across forwards so the
    per-call path contains no weight pad/cast HBM passes.
    """
    w1, w2, w3 = params["w1"], params["w2"], params["w3"]
    b1 = params["b1"].reshape(1, -1)
    b2 = params["b2"].reshape(1, -1)
    b3 = params["b3"].reshape(1, -1)
    F, H = w1.shape
    n_out = w3.shape[1]
    F_pad = _round_up(F, _LANE)
    H_pad = _round_up(H, _LANE)
    O_pad = _round_up(max(n_out, _LANE), _LANE)

    def pad2(a, r, c):
        return jnp.pad(a, ((0, r - a.shape[0]), (0, c - a.shape[1])))

    return {
        "w1": pad2(w1, F_pad, H_pad).astype(jnp.bfloat16),
        "b1": pad2(b1, 1, H_pad).astype(jnp.float32),
        "w2": pad2(w2, H_pad, H_pad).astype(jnp.bfloat16),
        "b2": pad2(b2, 1, H_pad).astype(jnp.float32),
        "w3": pad2(w3, H_pad, O_pad).astype(jnp.bfloat16),
        "b3": pad2(b3, 1, O_pad).astype(jnp.float32),
        "dims": (F, H, n_out, F_pad, H_pad, O_pad),
    }


def adversarial_network_forward(x, prepared, *, use_dropout: bool,
                                seed: int = 0, tile_b=None):
    """x: (B, in_feature) f32.  `prepared`: output of prepare_adversarial_network_params."""
    F, _H, n_out, F_pad, H_pad, O_pad = prepared["dims"]
    B = x.shape[0]
    assert x.shape[1] == F

    budget = _vmem_budget_bytes()
    if tile_b is None:
        tile_b = _auto_tile_b(B, F_pad, H_pad, O_pad, budget, x.dtype.itemsize)
    tile_b = max(_SUBLANE, _round_up(int(tile_b), _SUBLANE))
    B_pad = _round_up(B, tile_b)
    grid = (B_pad // tile_b,)

    # Pad x only when needed (no separate bf16 cast pass: the cast happens in-kernel).
    if (B_pad != B) or (F_pad != F):
        x = jnp.pad(x, ((0, B_pad - B), (0, F_pad - F)))

    seed_arr = jnp.asarray([seed], dtype=jnp.int32)

    def wspec(r, c):
        # Constant block index -> fetched once, VMEM-resident across all batch tiles.
        # TODO(synk): pl.Buffered(1) here (and Buffered(3) on x) would trim a VMEM copy /
        # deepen the x pipeline on v7x; kept at pipeline defaults for portability.
        return pl.BlockSpec((r, c), lambda i, s: (0, 0))

    grid_spec = pltpu.PrefetchScalarGridSpec(
        num_scalar_prefetch=1,                        # seed -> SMEM before the grid runs
        grid=grid,
        in_specs=[
            pl.BlockSpec((tile_b, F_pad), lambda i, s: (i, 0)),   # x batch tile
            wspec(F_pad, H_pad), wspec(1, H_pad),                 # w1, b1
            wspec(H_pad, H_pad), wspec(1, H_pad),                 # w2, b2
            wspec(H_pad, O_pad), wspec(1, O_pad),                 # w3, b3
        ],
        out_specs=pl.BlockSpec((tile_b, O_pad), lambda i, s: (i, 0)),
    )

    flops = 2 * B_pad * (F_pad * H_pad + H_pad * H_pad + H_pad * O_pad)
    bytes_accessed = (B_pad * F_pad * x.dtype.itemsize
                      + (F_pad * H_pad + H_pad * H_pad + H_pad * O_pad) * 2
                      + (2 * H_pad + O_pad) * 4
                      + B_pad * O_pad * 2)

    kernel = functools.partial(_adv_net_kernel, use_dropout=use_dropout)

    out = pl.pallas_call(
        kernel,
        out_shape=jax.ShapeDtypeStruct((B_pad, O_pad), jnp.bfloat16),
        grid_spec=grid_spec,
        compiler_params=pltpu.CompilerParams(
            dimension_semantics=("parallel",),        # batch tiles across TCs
            vmem_limit_bytes=int(budget),
        ),
        cost_estimate=pl.CostEstimate(
            flops=flops, transcendentals=0, bytes_accessed=bytes_accessed),
    )(seed_arr, x, prepared["w1"], prepared["b1"], prepared["w2"],
      prepared["b2"], prepared["w3"], prepared["b3"])

    return out[:B, :n_out].astype(jnp.float32)        # tiny slice+cast; heavy store was bf16


def init_adversarial_network_params(key, in_feature, hidden_size):
    """Xavier-normal weights, zero biases (mirrors init_weights for nn.Linear)."""
    def xavier_normal(k, fan_in, fan_out):
        std = (2.0 / (fan_in + fan_out)) ** 0.5
        return std * jax.random.normal(k, (fan_in, fan_out), dtype=jnp.float32)

    k1, k2, k3 = jax.random.split(key, 3)
    return {
        "w1": xavier_normal(k1, in_feature, hidden_size),
        "b1": jnp.zeros((1, hidden_size), jnp.float32),
        "w2": xavier_normal(k2, hidden_size, hidden_size),
        "b2": jnp.zeros((1, hidden_size), jnp.float32),
        "w3": xavier_normal(k3, hidden_size, 2),
        "b3": jnp.zeros((1, 2), jnp.float32),
    }


if __name__ == "__main__":
    key = jax.random.PRNGKey(0)
    kx, kp = jax.random.split(key)

    B, in_feature, hidden_size = 16, 32, 32
    x = jax.random.normal(kx, (B, in_feature), dtype=jnp.float32)
    params = init_adversarial_network_params(kp, in_feature, hidden_size)
    prepared = prepare_adversarial_network_params(params)   # one-time pad/cast

    # Eval-style forward (no dropout); tile_b=8 exercises a multi-step (grid=2) pipeline.
    y = adversarial_network_forward(x, prepared, use_dropout=False, seed=0, tile_b=8)
    y = jax.block_until_ready(y)
    assert y.shape == (B, 2)

    # Pure-JAX reference with the same bf16-operand / f32-accumulate matmul semantics.
    def ref_bf16(xx, p):
        bf = jnp.bfloat16
        h = jnp.dot(xx.astype(bf), p["w1"].astype(bf),
                    preferred_element_type=jnp.float32) + p["b1"]
        h = jnp.maximum(h, 0.0)
        h = jnp.dot(h.astype(bf), p["w2"].astype(bf),
                    preferred_element_type=jnp.float32) + p["b2"]
        h = jnp.maximum(h, 0.0)
        return jnp.dot(h.astype(bf), p["w3"].astype(bf),
                       preferred_element_type=jnp.float32) + p["b3"]

    y_ref = ref_bf16(x, params)
    assert jnp.allclose(y, y_ref, atol=3e-2, rtol=3e-2)   # bf16 logit storage tolerance

    # Sanity check vs full-f32 module numerics (loose tolerance: bf16 MXU operands).
    h = jnp.maximum(x @ params["w1"] + params["b1"], 0.0)
    h = jnp.maximum(h @ params["w2"] + params["b2"], 0.0)
    y_f32 = h @ params["w3"] + params["b3"]
    assert jnp.allclose(y, y_f32, atol=1.5e-1, rtol=1.5e-1)

    # Training-style forward (in-kernel dropout): runs, finite, deterministic per seed.
    y_d1 = jax.block_until_ready(
        adversarial_network_forward(x, prepared, use_dropout=True, seed=123, tile_b=8))
    y_d2 = jax.block_until_ready(
        adversarial_network_forward(x, prepared, use_dropout=True, seed=123, tile_b=8))
    y_d3 = jax.block_until_ready(
        adversarial_network_forward(x, prepared, use_dropout=True, seed=7, tile_b=8))
    assert y_d1.shape == (B, 2)
    assert jnp.all(jnp.isfinite(y_d1))
    assert jnp.array_equal(y_d1, y_d2)       # same seed -> identical masks
    assert y_d3.shape == (B, 2)

    print("KERNEL_OK")
</pallas_src>

<mosaic_0001>
module attributes {stable_mosaic.version = 11 : i64} {
  func.func @_adv_net_kernel(%arg0: i32, %arg1: memref<1xi32, #tpu.memory_space<smem>>, %arg2: memref<8x128xf32, #tpu.memory_space<vmem>>, %arg3: memref<128x128xbf16, #tpu.memory_space<vmem>>, %arg4: memref<1x128xf32, #tpu.memory_space<vmem>>, %arg5: memref<128x128xbf16, #tpu.memory_space<vmem>>, %arg6: memref<1x128xf32, #tpu.memory_space<vmem>>, %arg7: memref<128x128xbf16, #tpu.memory_space<vmem>>, %arg8: memref<1x128xf32, #tpu.memory_space<vmem>>, %arg9: memref<8x128xbf16, #tpu.memory_space<vmem>>) attributes {dimension_semantics = [#tpu.dimension_semantics<parallel>], iteration_bounds = array<i64: 2>, scalar_prefetch = 1 : i64, scratch_operands = 0 : i64, tpu.core_type = #tpu.core_type<tc>, window_params = [{transform_indices = @transform_0, window_bounds = array<i64: 8, 128>}, {pipeline_mode = #tpu.pipeline_mode<synchronous>, transform_indices = @transform_1, window_bounds = array<i64: 128, 128>}, {pipeline_mode = #tpu.pipeline_mode<synchronous>, transform_indices = @transform_2, window_bounds = array<i64: 1, 128>}, {pipeline_mode = #tpu.pipeline_mode<synchronous>, transform_indices = @transform_3, window_bounds = array<i64: 128, 128>}, {pipeline_mode = #tpu.pipeline_mode<synchronous>, transform_indices = @transform_4, window_bounds = array<i64: 1, 128>}, {pipeline_mode = #tpu.pipeline_mode<synchronous>, transform_indices = @transform_5, window_bounds = array<i64: 128, 128>}, {pipeline_mode = #tpu.pipeline_mode<synchronous>, transform_indices = @transform_6, window_bounds = array<i64: 1, 128>}, {transform_indices = @transform_7, window_bounds = array<i64: 8, 128>}]} {
    %c0 = arith.constant 0 : index
    %c0_0 = arith.constant 0 : index
    %0 = vector.load %arg2[%c0, %c0_0] : memref<8x128xf32, #tpu.memory_space<vmem>>, vector<8x128xf32>
    %1 = arith.truncf %0 : vector<8x128xf32> to vector<8x128xbf16>
    %c0_1 = arith.constant 0 : index
    %c0_2 = arith.constant 0 : index
    %2 = vector.load %arg3[%c0_1, %c0_2] : memref<128x128xbf16, #tpu.memory_space<vmem>>, vector<128x128xbf16>
    %cst = arith.constant dense<0.000000e+00> : vector<8x128xf32>
    %3 = tpu.matmul %1, %2, %cst {dimension_numbers = #tpu.dot_dimension_numbers<[1], [0], [0], [1], [0, 0, 1, 1], [], []>} : vector<8x128xbf16>, vector<128x128xbf16>, vector<8x128xf32> -> vector<8x128xf32>
    %c0_3 = arith.constant 0 : index
    %c0_4 = arith.constant 0 : index
    %4 = vector.load %arg4[%c0_3, %c0_4] : memref<1x128xf32, #tpu.memory_space<vmem>>, vector<1x128xf32>
    %5 = vector.broadcast %4 : vector<1x128xf32> to vector<8x128xf32>
    %6 = arith.addf %3, %5 : vector<8x128xf32>
    %cst_5 = arith.constant 0.000000e+00 : f32
    %7 = vector.broadcast %cst_5 : f32 to vector<8x128xf32>
    %8 = arith.maximumf %6, %7 : vector<8x128xf32>
    %9 = arith.truncf %8 : vector<8x128xf32> to vector<8x128xbf16>
    %c0_6 = arith.constant 0 : index
    %c0_7 = arith.constant 0 : index
    %10 = vector.load %arg5[%c0_6, %c0_7] : memref<128x128xbf16, #tpu.memory_space<vmem>>, vector<128x128xbf16>
    %cst_8 = arith.constant dense<0.000000e+00> : vector<8x128xf32>
    %11 = tpu.matmul %9, %10, %cst_8 {dimension_numbers = #tpu.dot_dimension_numbers<[1], [0], [0], [1], [0, 0, 1, 1], [], []>} : vector<8x128xbf16>, vector<128x128xbf16>, vector<8x128xf32> -> vector<8x128xf32>
    %c0_9 = arith.constant 0 : index
    %c0_10 = arith.constant 0 : index
    %12 = vector.load %arg6[%c0_9, %c0_10] : memref<1x128xf32, #tpu.memory_space<vmem>>, vector<1x128xf32>
    %13 = vector.broadcast %12 : vector<1x128xf32> to vector<8x128xf32>
    %14 = arith.addf %11, %13 : vector<8x128xf32>
    %cst_11 = arith.constant 0.000000e+00 : f32
    %15 = vector.broadcast %cst_11 : f32 to vector<8x128xf32>
    %16 = arith.maximumf %14, %15 : vector<8x128xf32>
    %17 = arith.truncf %16 : vector<8x128xf32> to vector<8x128xbf16>
    %c0_12 = arith.constant 0 : index
    %c0_13 = arith.constant 0 : index
    %18 = vector.load %arg7[%c0_12, %c0_13] : memref<128x128xbf16, #tpu.memory_space<vmem>>, vector<128x128xbf16>
    %cst_14 = arith.constant dense<0.000000e+00> : vector<8x128xf32>
    %19 = tpu.matmul %17, %18, %cst_14 {dimension_numbers = #tpu.dot_dimension_numbers<[1], [0], [0], [1], [0, 0, 1, 1], [], []>} : vector<8x128xbf16>, vector<128x128xbf16>, vector<8x128xf32> -> vector<8x128xf32>
    %c0_15 = arith.constant 0 : index
    %c0_16 = arith.constant 0 : index
    %20 = vector.load %arg8[%c0_15, %c0_16] : memref<1x128xf32, #tpu.memory_space<vmem>>, vector<1x128xf32>
    %21 = vector.broadcast %20 : vector<1x128xf32> to vector<8x128xf32>
    %22 = arith.addf %19, %21 : vector<8x128xf32>
    %23 = arith.truncf %22 : vector<8x128xf32> to vector<8x128xbf16>
    %c0_17 = arith.constant 0 : index
    %c0_18 = arith.constant 0 : index
    %24 = vector.load %arg9[%c0_17, %c0_18] : memref<8x128xbf16, #tpu.memory_space<vmem>>, vector<8x128xbf16>
    tpu.vector_store %arg9[%c0_17, %c0_18], %23 {strides = array<i32>} : memref<8x128xbf16, #tpu.memory_space<vmem>>, vector<8x128xbf16>,
    return
  }
  func.func @transform_0(%arg0: i32, %arg1: memref<1xi32, #tpu.memory_space<smem>>) -> (i32, i32) {
    %c0_i32 = arith.constant 0 : i32
    %c0_i32_0 = arith.constant 0 : i32
    return %arg0, %c0_i32 : i32, i32
  }
  func.func @transform_1(%arg0: i32, %arg1: memref<1xi32, #tpu.memory_space<smem>>) -> (i32, i32) {
    %c0_i32 = arith.constant 0 : i32
    %c0_i32_0 = arith.constant 0 : i32
    %c0_i32_1 = arith.constant 0 : i32
    return %c0_i32, %c0_i32_0 : i32, i32
  }
  func.func @transform_2(%arg0: i32, %arg1: memref<1xi32, #tpu.memory_space<smem>>) -> (i32, i32) {
    %c0_i32 = arith.constant 0 : i32
    %c0_i32_0 = arith.constant 0 : i32
    %c0_i32_1 = arith.constant 0 : i32
    return %c0_i32, %c0_i32_0 : i32, i32
  }
  func.func @transform_3(%arg0: i32, %arg1: memref<1xi32, #tpu.memory_space<smem>>) -> (i32, i32) {
    %c0_i32 = arith.constant 0 : i32
    %c0_i32_0 = arith.constant 0 : i32
    %c0_i32_1 = arith.constant 0 : i32
    return %c0_i32, %c0_i32_0 : i32, i32
  }
  func.func @transform_4(%arg0: i32, %arg1: memref<1xi32, #tpu.memory_space<smem>>) -> (i32, i32) {
    %c0_i32 = arith.constant 0 : i32
    %c0_i32_0 = arith.constant 0 : i32
    %c0_i32_1 = arith.constant 0 : i32
    return %c0_i32, %c0_i32_0 : i32, i32
  }
  func.func @transform_5(%arg0: i32, %arg1: memref<1xi32, #tpu.memory_space<smem>>) -> (i32, i32) {
    %c0_i32 = arith.constant 0 : i32
    %c0_i32_0 = arith.constant 0 : i32
    %c0_i32_1 = arith.constant 0 : i32
    return %c0_i32, %c0_i32_0 : i32, i32
  }
  func.func @transform_6(%arg0: i32, %arg1: memref<1xi32, #tpu.memory_space<smem>>) -> (i32, i32) {
    %c0_i32 = arith.constant 0 : i32
    %c0_i32_0 = arith.constant 0 : i32
    %c0_i32_1 = arith.constant 0 : i32
    return %c0_i32, %c0_i32_0 : i32, i32
  }
  func.func @transform_7(%arg0: i32, %arg1: memref<1xi32, #tpu.memory_space<smem>>) -> (i32, i32) {
    %c0_i32 = arith.constant 0 : i32
    %c0_i32_0 = arith.constant 0 : i32
    return %arg0, %c0_i32 : i32, i32
  }
}

</mosaic_0001>

<bundles_post_ra>
// kernel: tpu_custom_call.1
= control target key start
LH: loop header
LB: loop body
LE: loop exit
PB: predicated region body
PF: predicated region fallthrough
CT: control target
= control target key end

     0   :  { %14 = vsyncpa [#allocation5], 0  ;;  %s1582_s0 = inlined_call_operand.<no memory space> [shape: s32[1], index: 0, kind: input, shape index: {}]   ;;  %s1583_s1 = inlined_call_operand.hbm [shape: f32[16,128], index: 1, kind: input, shape index: {}]   ;;  %s1584_s2 = inlined_call_operand.hbm [shape: bf16[128,128], index: 2, kind: input, shape index: {}]   ;;  %s1585_s3 = inlined_call_operand.vmem [shape: f32[1,128], index: 3, kind: input, shape index: {}]   ;;  %s1586_s4 = inlined_call_operand.hbm [shape: bf16[128,128], index: 4, kind: input, shape index: {}]   ;;  %s1587_s5 = inlined_call_operand.vmem [shape: f32[1,128], index: 5, kind: input, shape index: {}]   ;;  %s1588_s6 = inlined_call_operand.hbm [shape: bf16[128,128], index: 6, kind: input, shape index: {}]   ;;  %s1589_s7 = inlined_call_operand.vmem [shape: f32[1,128], index: 7, kind: input, shape index: {}]   ;;  %s1590_s8 = inlined_call_operand.hbm [shape: bf16[16,128], index: 8, kind: output, shape index: {}]  }
   0x1   :  { %16 = vsyncpa [#allocation5 + $0x1], 0 }
   0x2   :  { %17 = vsyncpa [#allocation8], 0 }
   0x3   :  { %18 = vsyncpa [#allocation11], 0 }
   0x4   :  { %19 = vsyncpa [#allocation6], 0 }
   0x5   :  { %21 = vsyncpa [#allocation6 + $0x1], 0  ;;  %s1276_s26 = smov 0   ;;  %s1278_s27 = smov 0  }
   0x6   :  { %s1280_s28 = smov 0   ;;  %s1282_s29 = smov 0  }
   0x7 LB: > { %s1297_s30 = sadd.s32 4294967295, %s1220_s29   ;;  %s795_s9 = sadd.s32 4294967294, %s1220_s29   ;;  %s1220_s29 = sphi %s1282_s29, %s1616_s29   ;;  %s1216_s28 = sphi %s1280_s28, %s1615_s28   ;;  %s1212_s27 = sphi %s1278_s27, %s1614_s27   ;;  %s1208_s26 = sphi %s1276_s26, %s1613_s26  }
   0x8   : > { %p47_p0 = scmp.ne.s32.totalorder %s1212_s27, %s1208_s26  ;;  %p1591_p1 = scmp.eq.s32.totalorder %s1297_s30, 0 }
   0x9   : > { %p203_p3 = scmp.eq.s32.totalorder %s795_s9, 1  ;;  %p796_p5 = scmp.ge.s32.totalorder %s1220_s29, 1 }
   0xa   : > { %p1306_p4 = por %p1591_p1, %p47_p0  ;;  %p210_p7 = scmp.lt.s32.totalorder %s1220_s29, 3 }
   0xb   : > { %p1311_p6 = por %p203_p3, %p47_p0  ;;  %s1222_s13 = smov [#allocation7]  }
   0xc   : > { %s1595_s10 = scalar_select %p1306_p4, 1, 0 }
   0xd   : > { %s1596_s11 = scalar_select %p1311_p6, 1, 0 }
   0xe   : > { %p1316_p8 = pnand %p796_p5, %p210_p7  ;;  %s222_s14 = sshll.u32 %s1222_s13, 4  ;;  %s1320_s14 = int_to_ptr.vmem [resolvable:$true] %s222_s14 }
   0xf   : > { %1597 = sst [smem:[#allocation17_spill]] %s1596_s11  ;;  %s1223_s16 = smov [#allocation9]  }
  0x10   : > { %s1598_s12 = scalar_select %p1316_p8, 1, 0 }
  0x11   : > { %p943_p9 = pneg %p1316_p8  ;;  %s238_s17 = sshll.u32 %s1223_s16, 4  ;;  %s1331_s17 = int_to_ptr.vmem [resolvable:$true] %s238_s17 }
  0x12   : > { %s1224_s18 = smov [#allocation10]   ;;  %s1032_s22 = scalar_lea.hbm %s1584_s2, 1024 }
  0x13   : > { %p1327_p11 = pnand %p943_p9, %p1591_p1  ;;  %s1333_s19 = sshll.u32 %s1224_s18, 4  ;;  %s255_s19 = int_to_ptr.vmem [resolvable:$true] %s1333_s19 }
  0x14   : > { %p1033_p12 = scmp.ne.s32.totalorder %s1584_s2, %s1032_s22  ;;  %p1039_p5 = scmp.lt.u32.totalorder %s1032_s22, %s1584_s2 }
  0x15   : > { %p1343_p13 = pneg %p1327_p11 }
  0x17   : > { %p1035_p0 = pnand %p1343_p13, %p1033_p12 }
  0x19   : > { %p1036_p3 = pneg %p1035_p0 }
  0x1b   : > { %p1041_p7 = pnand %p1039_p5, %p1036_p3 }
  0x1d   : > { %1044 = shalt.err (!%p1041_p7)
}
  0x1e   : > { %s1045_s13 = scalar_lea.vmem %s1320_s14, 1024  ;;  %p1053_p2 = scmp.lt.s32.totalorder %s1320_s14, %s1320_s14 }
  0x1f   : > { %p1046_p9 = scmp.ne.s32.totalorder %s1320_s14, %s1045_s13  ;;  %p1054_p6 = scmp.lt.s32.totalorder %s1045_s13, %s1045_s13 }
  0x21   : > { %p1048_p10 = pnand %p1046_p9, %p1343_p13  ;;  %p1055_p12 = por %p1054_p6, %p1053_p2 }
  0x23   : > { %p1049_p1 = pneg %p1048_p10 }
  0x25   : > { %p1056_p0 = pnand %p1055_p12, %p1049_p1 }
  0x27   : > { %1059 = shalt.err (!%p1056_p0)
}
  0x28   : > { %s1225_s16 = smov 64   ;;  %s1226_s18 = smov 4  }
  0x29   : > { %946 = dma.hbm_to_vmem [thread:$0]  (!%p1327_p11), %s1584_s2, 1024, %s1320_s14, [#allocation8], %s1225_s16, %s1225_s16, %s1226_s18  }
  0x2a   : > { %s1060_s0 = scalar_lea.hbm %s1586_s4, 1024 }
  0x2b   : > { %p1061_p1 = scmp.ne.s32.totalorder %s1586_s4, %s1060_s0  ;;  %p1067_p10 = scmp.lt.u32.totalorder %s1060_s0, %s1586_s4 }
  0x2d   : > { %p1063_p2 = pnand %p1061_p1, %p1343_p13 }
  0x2f   : > { %p1064_p6 = pneg %p1063_p2 }
  0x31   : > { %p1069_p3 = pnand %p1067_p10, %p1064_p6 }
  0x33   : > { %1072 = shalt.err (!%p1069_p3)
}
  0x34   : > { %s1073_s14 = scalar_lea.vmem %s1331_s17, 1024  ;;  %p1081_p12 = scmp.lt.s32.totalorder %s1331_s17, %s1331_s17 }
  0x35   : > { %p1074_p5 = scmp.ne.s32.totalorder %s1331_s17, %s1073_s14  ;;  %p1082_p0 = scmp.lt.s32.totalorder %s1073_s14, %s1073_s14 }
  0x37   : > { %p1076_p7 = pnand %p1074_p5, %p1343_p13  ;;  %p1083_p1 = por %p1082_p0, %p1081_p12 }
  0x39   : > { %p1077_p9 = pneg %p1076_p7 }
  0x3b   : > { %p1084_p2 = pnand %p1083_p1, %p1077_p9 }
  0x3d   : > { %1087 = shalt.err (!%p1084_p2)
}
  0x3e   : > { %949 = dma.hbm_to_vmem [thread:$0]  (!%p1327_p11), %s1586_s4, 1024, %s1331_s17, [#allocation8], %s1225_s16, %s1225_s16, %s1226_s18  }
  0x3f   : > { %s1088_s23 = scalar_lea.hbm %s1588_s6, 1024 }
  0x40   : > { %p1089_p6 = scmp.ne.s32.totalorder %s1588_s6, %s1088_s23  ;;  %p1095_p5 = scmp.lt.u32.totalorder %s1088_s23, %s1588_s6 }
  0x42   : > { %p1091_p10 = pnand %p1089_p6, %p1343_p13 }
  0x44   : > { %p1092_p3 = pneg %p1091_p10 }
  0x46   : > { %p1097_p7 = pnand %p1095_p5, %p1092_p3 }
  0x48   : > { %1100 = shalt.err (!%p1097_p7)
}
  0x49   : > { %s1101_s14 = scalar_lea.vmem %s255_s19, 1024  ;;  %p1109_p1 = scmp.lt.s32.totalorder %s255_s19, %s255_s19 }
  0x4a   : > { %p1102_p9 = scmp.ne.s32.totalorder %s255_s19, %s1101_s14  ;;  %p1110_p2 = scmp.lt.s32.totalorder %s1101_s14, %s1101_s14 }
  0x4c   : > { %p1104_p12 = pnand %p1102_p9, %p1343_p13  ;;  %p1111_p4 = por %p1110_p2, %p1109_p1 }
  0x4e   : > { %p1105_p0 = pneg %p1104_p12 }
  0x50   : > { %p1112_p8 = pnand %p1111_p4, %p1105_p0 }
  0x52   : > { %1115 = shalt.err (!%p1112_p8)
}
  0x53   : > { %952 = dma.hbm_to_vmem [thread:$0]  (!%p1327_p11), %s1588_s6, 1024, %s255_s19, [#allocation11], %s1225_s16, %s1225_s16, %s1226_s18  }
  0x54   : > { %s1416_s24 = sadd.s32 1, %s1220_s29   ;;  %s34_s20 = sadd.s32 1, %s1216_s28 }
  0x55   : > { %s31_s15 = ssub.s32 %s1220_s29, %s1416_s24  ;;  %p41_p8 = scmp.ne.s32.totalorder %s1216_s28, %s1212_s27 }
  0x56   : > { %p32_p4 = scmp.eq.s32.totalorder %s31_s15, 0  ;;  %p42_p13 = scmp.eq.s32.totalorder %s1220_s29, 0 }
  0x57   : > { %p964_p6 = scmp.lt.s32.totalorder %s1220_s29, 2  ;;  %p1601_p3 = scmp.eq.s32.totalorder %s1297_s30, 1 }
  0x58   : > { %s1426_s21 = scalar_select %p32_p4, %s1216_s28, %s34_s20  }
  0x59   : > { %p43_p10 = por %p42_p13, %p41_p8  ;;  %p1430_p5 = por %p1601_p3, %p41_p8 }
  0x5a   : > { %s271_s23 = sand.u32 1, %s1216_s28   ;;  %s802_s0 = sshll.u32 %s1220_s29, 7 }
  0x5b   : > { %s801_s19 = sshll.u32 %s271_s23, 3  ;;  %s1439_s25 = scalar_lea.hbm %s1583_s1, %s802_s0 }
  0x5c   : > { %s275_s9 = scalar_lea.vmem [#allocation4], %s801_s19  ;;  %p1441_p11 = pnand %p964_p6, %p43_p10 }
  0x5d   : > { %s282_s13 = sshll.u32 %s275_s9, 4  ;;  %s272_s17 = scalar_lea.sflag [#allocation5], %s271_s23  ;;  %s1445_s13 = int_to_ptr.vmem [resolvable:$true] %s282_s13 }
  0x5e   : > { %s1116_s11 = scalar_lea.hbm %s1439_s25, 128  ;;  %p1118_p9 = pneg %p1441_p11 }
  0x5f   : > { %p1117_p7 = scmp.ne.s32.totalorder %s1439_s25, %s1116_s11  ;;  %s1121_s0 = scalar_lea.hbm %s1583_s1, 256 }
  0x60   : > { %p1122_p1 = scmp.lt.u32.totalorder %s1439_s25, %s1583_s1  ;;  %p1123_p2 = scmp.lt.u32.totalorder %s1121_s0, %s1116_s11 }
  0x61   : > { %p1119_p12 = pnand %p1118_p9, %p1117_p7  ;;  %p1125_p8 = scmp.lt.u32.totalorder %s1116_s11, %s1439_s25 }
  0x62   : > { %p1124_p4 = por %p1123_p2, %p1122_p1 }
  0x63   : > { %p1120_p0 = pneg %p1119_p12 }
  0x64   : > { %p1126_p13 = por %p1125_p8, %p1124_p4 }
  0x66   : > { %p1127_p6 = pnand %p1126_p13, %p1120_p0 }
  0x68   : > { %1130 = shalt.err (!%p1127_p6)
}
  0x69   : > { %s1131_s23 = scalar_lea.vmem %s1445_s13, 128  ;;  %s1227_s18 = smov [#allocation4]  }
  0x6a   : > { %p1132_p10 = scmp.ne.s32.totalorder %s1445_s13, %s1131_s23  ;;  %s1136_s9 = sshll.u32 %s1227_s18, 4  ;;  %s1137_s9 = int_to_ptr.vmem [resolvable:$false] %s1136_s9 }
  0x6b   : > { %s1138_s15 = scalar_lea.vmem %s1137_s9, 256  ;;  %p1139_p12 = scmp.lt.s32.totalorder %s1445_s13, %s1137_s9 }
  0x6c   : > { %p1134_p3 = pnand %p1132_p10, %p1118_p9  ;;  %p1140_p1 = scmp.lt.s32.totalorder %s1138_s15, %s1131_s23 }
  0x6e   : > { %p1135_p7 = pneg %p1134_p3  ;;  %p1141_p2 = por %p1140_p1, %p1139_p12 }
  0x70   : > { %p1142_p4 = pnand %p1141_p2, %p1135_p7 }
  0x72   : > { %1145 = shalt.err (!%p1142_p4)
}
  0x73   : > { %956 = dma.hbm_to_vmem [thread:$0]  (!%p1441_p11), %s1439_s25, 128, %s1445_s13, %s272_s17  }
  0x74   : > { %p1604_p0 = scmp.ne.s32.totalorder %s1598_s12, 0 }
  0x75   : > { %s1475_s11 = sand.u32 (!%p1604_p0), 1, %s1212_s27   ;;  %p1605_p9 = scmp.ne.s32.totalorder (!%p1604_p0), %s1595_s10, 0 }
  0x76   : > { %291 = sbr.rel (%p1604_p0) target bundleno = 833 (0x341), region = 48  ;;  %s804_s20 = sshll.u32 (!%p1604_p0), %s1475_s11, 3 }
  0x77   : > { %s294_s0 = scalar_lea.sflag (!%p1604_p0), [#allocation5], %s1475_s11  ;;  %s1479_s19 = scalar_lea.vmem (!%p1604_p0), [#allocation4], %s804_s20 }
  0x7d   : > { %1191 = dma.done.wait (%p1605_p9), %s294_s0, 128  }
  0x7e   : > { %1193 = vsyncadd (%p1605_p9), %s294_s0, 4294967168  ;;  %p1606_p11 = scmp.eq.s32.totalorder %s1297_s30, 0 }
  0x80   : > { %1195 = dma.done.wait (%p1606_p11), [#allocation8], 2048   ;;  %p1607_p8 = pmov %p1606_p11 }
  0x82   : > { %1197 = vsyncadd (%p1607_p8), [#allocation8], 4294965248  ;;  %p1608_p13 = pmov %p1607_p8 }
  0x83   : > { %p1609_p6 = pmov %p1607_p8 }
  0x84   : > { %1199 = dma.done.wait (%p1608_p13), [#allocation11], 1024  }
  0x85   : > { %1201 = vsyncadd (%p1609_p6), [#allocation11], 4294966272  ;;  %v1228_v0 = vmov 0.0   ;;  %vm1229_vm0 = vmmov 0   ;;  %v1008_v1 = vld [vmem:[#allocation7] sm:$0xff]   ;;  %v1009_v2 = vld [vmem:[#allocation7 + $0x8] sm:$0xff]  }
  0x86   : > { %867 = vmatprep.subr.bf16.mxu0 %v1228_v0  ;;  %883 = vmatprep.mubr.msk.bf16.mxu0 %vm1229_vm0, %v1228_v0  ;;  %v1010_v3 = vld [vmem:[#allocation7 + $0x10] sm:$0xff]   ;;  %v1016_v4 = vld [vmem:[#allocation9] sm:$0xff]   ;;  %v1011_v5 = vld [vmem:[#allocation7 + $0x18] sm:$0xff]   ;;  %s808_s14 = sshll.u32 %s1475_s11, 2  ;;  %s837_s23 = sshll.u32 %s1297_s30, 6 }
  0x87   : > { %887 = vmatprep.subr.bf16.mxu1 %v1228_v0  ;;  %903 = vmatprep.mubr.msk.bf16.mxu1 %vm1229_vm0, %v1228_v0  ;;  %v1017_v6 = vld [vmem:[#allocation9 + $0x8] sm:$0xff]   ;;  %v1012_v7 = vld [vmem:[#allocation7 + $0x20] sm:$0xff]   ;;  %v1018_v8 = vld [vmem:[#allocation9 + $0x10] sm:$0xff]   ;;  %s339_s18 = scalar_lea.vmem [#allocation12], %s808_s14  ;;  %s1538_s0 = scalar_lea.hbm %s1590_s8, %s837_s23 }
  0x88   : > { %868 = vmatpush3.bf16.msra.mxu0 %v1008_v1  ;;  %888 = vmatpush3.bf16.msra.mxu1 %v1016_v4  ;;  %v1013_v9 = vld [vmem:[#allocation7 + $0x28] sm:$0xff]   ;;  %v1019_v10 = vld [vmem:[#allocation9 + $0x18] sm:$0xff]   ;;  %v1014_v11 = vld [vmem:[#allocation7 + $0x30] sm:$0xff]   ;;  %s696_s9 = sshll.u32 %s339_s18, 4  ;;  %s1230_s10 = smov [#allocation12]   ;;  %s1540_s9 = int_to_ptr.vmem [resolvable:$true] %s696_s9 }
  0x89   : > { %869 = vmatprep.subr.bf16.mxu0 %v1228_v0  ;;  %889 = vmatprep.subr.bf16.mxu1 %v1228_v0  ;;  %v1020_v12 = vld [vmem:[#allocation9 + $0x20] sm:$0xff]   ;;  %v1015_v13 = vld [vmem:[#allocation7 + $0x38] sm:$0xff]   ;;  %v1021_v15 = vld [vmem:[#allocation9 + $0x28] sm:$0xff]   ;;  %s1146_s30 = scalar_lea.vmem %s1540_s9, 64  ;;  %s1150_s12 = sshll.u32 %s1230_s10, 4  ;;  %s1151_s12 = int_to_ptr.vmem [resolvable:$false] %s1150_s12 }
  0x8a   : > { %v341_v14 = vld [vmem:[%s1479_s19] sm:$0xff]  ;;  %v1024_v19 = vld [vmem:[#allocation10] sm:$0xff]   ;;  %v1025_v20 = vld [vmem:[#allocation10 + $0x8] sm:$0xff]   ;;  %s683_s19 = scalar_lea.sflag [#allocation6], %s1475_s11  ;;  %p1147_p10 = scmp.ne.s32.totalorder %s1540_s9, %s1146_s30 }
  0x8b   : > { %v342_v16 = vpack.c.bf16 %v341_v14, %v341_v14  ;;  %v1022_v17 = vld [vmem:[#allocation9 + $0x30] sm:$0xff]   ;;  %v1023_v18 = vld [vmem:[#allocation9 + $0x38] sm:$0xff]   ;;  %v1028_v23 = vld [vmem:[#allocation10 + $0x20] sm:$0xff]   ;;  %s1152_s25 = scalar_lea.vmem %s1151_s12, 128  ;;  %p1153_p12 = scmp.lt.s32.totalorder %s1540_s9, %s1151_s12 }
  0x8c   : > { %870 = vmatpush3.bf16.msra.mxu0 %v1009_v2  ;;  %890 = vmatpush3.bf16.msra.mxu1 %v1017_v6  ;;  %v1026_v21 = vld [vmem:[#allocation10 + $0x10] sm:$0xff]   ;;  %v1027_v22 = vld [vmem:[#allocation10 + $0x18] sm:$0xff]   ;;  %v1029_v24 = vld [vmem:[#allocation10 + $0x28] sm:$0xff]   ;;  %p1148_p3 = pnand %p1147_p10, %p1430_p5  ;;  %p1154_p1 = scmp.lt.s32.totalorder %s1152_s25, %s1146_s30 }
  0x8d   : > { %871 = vmatprep.subr.bf16.mxu0 %v1228_v0  ;;  %891 = vmatprep.subr.bf16.mxu1 %v1228_v0  ;;  %v809_v25 = vld [vmem:[%s1585_s3] ss:$0 sm:$0xff]  ;;  %v1031_v34 = vld [vmem:[#allocation10 + $0x38] sm:$0xff]  }
  0x8e   : > { %v1030_v33 = vld [vmem:[#allocation10 + $0x30] sm:$0xff]   ;;  %p1149_p7 = pneg %p1148_p3  ;;  %p1155_p2 = por %p1154_p1, %p1153_p12 }
  0x8f   : > { %v818_v35 = vld [vmem:[%s1587_s5] ss:$0 sm:$0xff] }
  0x90   : > { %872 = vmatpush3.bf16.msra.mxu0 %v1010_v3  ;;  %892 = vmatpush3.bf16.msra.mxu1 %v1018_v8  ;;  %v827_v43 = vld [vmem:[%s1589_s7] ss:$0 sm:$0xff]  ;;  %p1156_p4 = pnand %p1155_p2, %p1149_p7 }
  0x91   : > { %873 = vmatprep.subr.bf16.mxu0 %v1228_v0  ;;  %893 = vmatprep.subr.bf16.mxu1 %v1228_v0 }
  0x94   : > { %874 = vmatpush3.bf16.msra.mxu0 %v1011_v5  ;;  %894 = vmatpush3.bf16.msra.mxu1 %v1019_v10 }
  0x95   : > { %875 = vmatprep.subr.bf16.mxu0 %v1228_v0  ;;  %895 = vmatprep.subr.bf16.mxu1 %v1228_v0 }
  0x98   : > { %876 = vmatpush3.bf16.msra.mxu0 %v1012_v7  ;;  %896 = vmatpush3.bf16.msra.mxu1 %v1020_v12 }
  0x99   : > { %877 = vmatprep.subr.bf16.mxu0 %v1228_v0  ;;  %897 = vmatprep.subr.bf16.mxu1 %v1228_v0 }
  0x9c   : > { %878 = vmatpush3.bf16.msra.mxu0 %v1013_v9  ;;  %898 = vmatpush3.bf16.msra.mxu1 %v1021_v15 }
  0x9d   : > { %879 = vmatprep.subr.bf16.mxu0 %v1228_v0  ;;  %899 = vmatprep.subr.bf16.mxu1 %v1228_v0 }
  0xa0   : > { %880 = vmatpush3.bf16.msra.mxu0 %v1014_v11  ;;  %900 = vmatpush3.bf16.msra.mxu1 %v1022_v17 }
  0xa1   : > { %881 = vmatprep.subr.bf16.mxu0 %v1228_v0  ;;  %901 = vmatprep.subr.bf16.mxu1 %v1228_v0 }
  0xa4   : > { %882 = vmatpush3.bf16.msra.mxu0 %v1015_v13  ;;  %902 = vmatpush3.bf16.msra.mxu1 %v1023_v18 }
  0xa5   : > { %907 = vmatprep.subr.bf16.mxu0 %v1228_v0 }
  0xa7   : > { %884 = vmatmul.mubr.bf16.vlgmr.msra.gmra.mrb[0].mxu0 %v342_v16 }
  0xa8   : > { %923 = vmatprep.mubr.msk.bf16.mxu0 %vm1229_vm0, %v1228_v0  ;;  %908 = vmatpush3.bf16.msra.mxu0 %v1024_v19 }
  0xa9   : > { %909 = vmatprep.subr.bf16.mxu0 %v1228_v0 }
  0xac   : > { %910 = vmatpush3.bf16.msra.mxu0 %v1025_v20 }
  0xad   : > { %911 = vmatprep.subr.bf16.mxu0 %v1228_v0 }
  0xb0   : > { %912 = vmatpush3.bf16.msra.mxu0 %v1026_v21 }
  0xb1   : > { %913 = vmatprep.subr.bf16.mxu0 %v1228_v0 }
  0xb4   : > { %914 = vmatpush3.bf16.msra.mxu0 %v1027_v22 }
  0xb5   : > { %915 = vmatprep.subr.bf16.mxu0 %v1228_v0 }
  0xb8   : > { %916 = vmatpush3.bf16.msra.mxu0 %v1028_v23 }
  0xb9   : > { %917 = vmatprep.subr.bf16.mxu0 %v1228_v0 }
  0xbc   : > { %918 = vmatpush3.bf16.msra.mxu0 %v1029_v24 }
  0xbd   : > { %919 = vmatprep.subr.bf16.mxu0 %v1228_v0 }
  0xc0   : > { %920 = vmatpush3.bf16.msra.mxu0 %v1030_v33 }
  0xc1   : > { %921 = vmatprep.subr.bf16.mxu0 %v1228_v0 }
  0xc4   : > { %922 = vmatpush3.bf16.msra.mxu0 %v1031_v34 }
 0x17a   : > { %v448_v26 = vpop.f32.mrb[0].mxu0 }
 0x17b   : > { %v449_v27 = vadd.f32 %v809_v25, %v448_v26  ;;  %v885_v28 = vpop.f32.mrb[1].mxu0 }
 0x17c   : > { %v451_v29 = vpop.f32.mrb[2].mxu0 }
 0x17d   : > { %v454_v30 = vmax.f32 %v449_v27, 0.0  ;;  %v886_v31 = vpop.f32.mrb[3].mxu0 }
 0x17f   : > { %v455_v32 = vpack.c.bf16 %v454_v30, %v454_v30 }
 0x181   : > { %904 = vmatmul.mubr.bf16.vlgmr.msra.gmra.mrb[0].mxu1 %v455_v32 }
 0x254   : > { %v561_v36 = vpop.f32.mrb[0].mxu1 }
 0x255   : > { %v562_v37 = vadd.f32 %v818_v35, %v561_v36  ;;  %v905_v38 = vpop.f32.mrb[1].mxu1 }
 0x256   : > { %v564_v39 = vpop.f32.mrb[2].mxu1 }
 0x257   : > { %v567_v40 = vmax.f32 %v562_v37, 0.0  ;;  %v906_v41 = vpop.f32.mrb[3].mxu1 }
 0x259   : > { %v568_v42 = vpack.c.bf16 %v567_v40, %v567_v40 }
 0x25b   : > { %924 = vmatmul.mubr.bf16.vlgmr.msra.gmra.mrb[4].mxu0 %v568_v42 }
 0x32e   : > { %v674_v44 = vpop.f32.mrb[4].mxu0 }
 0x32f   : > { %v675_v45 = vadd.f32 %v827_v43, %v674_v44  ;;  %v925_v46 = vpop.f32.mrb[5].mxu0 }
 0x330   : > { %v677_v47 = vpop.f32.mrb[6].mxu0 }
 0x331   : > { %v680_v48 = vpack.c.bf16 %v675_v45, %v675_v45  ;;  %v926_v49 = vpop.f32.mrb[7].mxu0 }
 0x333   : > { %681 = vst [vmem:[%s339_s18] sm:$0xf] %v680_v48 }
 0x334   : > { %1159 = shalt.err (!%p1156_p4)
}
 0x335   : > { %s1160_s11 = scalar_lea.hbm %s1538_s0, 64  ;;  %s1164_s17 = scalar_lea.hbm %s1590_s8, 128 }
 0x336   : > { %p1161_p0 = scmp.ne.s32.totalorder %s1538_s0, %s1160_s11  ;;  %p1165_p8 = scmp.lt.u32.totalorder %s1538_s0, %s1590_s8 }
 0x337   : > { %p1166_p13 = scmp.lt.u32.totalorder %s1164_s17, %s1160_s11  ;;  %p1168_p10 = scmp.lt.u32.totalorder %s1160_s11, %s1538_s0 }
 0x338   : > { %p1162_p9 = pnand %p1161_p0, %p1430_p5 }
 0x339   : > { %p1167_p6 = por %p1166_p13, %p1165_p8 }
 0x33a   : > { %p1163_p11 = pneg %p1162_p9 }
 0x33b   : > { %p1169_p3 = por %p1168_p10, %p1167_p6 }
 0x33d   : > { %p1170_p7 = pnand %p1169_p3, %p1163_p11 }
 0x33f   : > { %1173 = shalt.err (!%p1170_p7)
}
 0x340   : > { %941 = dma.vmem_to_hbm [thread:$0]  (%p1430_p5), %s1540_s9, 64, %s1538_s0, %s683_s19  }
 0x341 PF: > { %s1610_s18 = sld [smem:[#allocation17_spill]]  ;;  %s708_s15 = sand.u32 1, %s1208_s26  }
 0x342   : > { %p1612_p1 = scmp.ge.s32.totalorder %s1220_s29, 2  ;;  %s709_s20 = scalar_lea.sflag [#allocation6], %s708_s15 }
 0x347   : > { %p1611_p12 = scmp.ne.s32.totalorder %s1610_s18, 0 }
 0x349   : > { %p958_p2 = pnand %p1612_p1, %p1611_p12 }
 0x34b   : > { %1203 = dma.done.wait (!%p958_p2), %s709_s20, 64  }
 0x34c   : > { %1205 = vsyncadd (!%p958_p2), %s709_s20, 4294967232  ;;  %p24_p4 = scmp.ge.s32.totalorder %s1416_s24, 4   ;;  %s1613_s26 = smov %s1212_s27 }
 0x34d   : > { %s1614_s27 = smov %s1216_s28  ;;  %s1615_s28 = smov %s1426_s21 }
 0x34e   : > { %s1616_s29 = smov %s1416_s24  ;;  %26 = sbr.rel (!%p24_p4) target bundleno = 7 (0x7), region = 105 }
 0x355   :  { %714 = vsyncpa [#allocation5], 1 }
 0x356   :  { %716 = vsyncpa [#allocation5 + $0x1], 1 }
 0x357   :  { %717 = vsyncpa [#allocation8], 1 }
 0x358   :  { %718 = vsyncpa [#allocation11], 1 }
 0x359   :  { %719 = vsyncpa [#allocation6], 1 }
 0x35a   :  { %721 = vsyncpa [#allocation6 + $0x1], 1 }

</bundles_post_ra>
